<compile_context>
chip_gen: v6e
topology: v6e:2x2x1
jax: 0.10.0
libtpu: 0.0.40
codegen_flags: <defaults>
</compile_context>

<pallas_src>
import functools

import jax
import jax.numpy as jnp
from jax.experimental import pallas as pl
from jax.experimental.pallas import tpu as pltpu

D_MODEL = 32
NUM_HEADS = 4
HEAD_DIM = D_MODEL // NUM_HEADS
LN_EPS = 1e-5  # torch.nn.LayerNorm default


def _layer_norm(a, gamma, beta):
    mu = jnp.mean(a, axis=-1, keepdims=True)
    var = jnp.mean((a - mu) ** 2, axis=-1, keepdims=True)
    return (a - mu) * jax.lax.rsqrt(var + LN_EPS) * gamma + beta


def encoder_block_kernel(x_ref, w_all_ref, wff_ref, pvec_ref, o_ref, *, b_blk, seq_len):
    D, H, HD = D_MODEL, NUM_HEADS, HEAD_DIM
    rows = b_blk * seq_len

    x = x_ref[...]                      # (rows, D)
    pv = pvec_ref[...]                  # (8, D) stacked small params
    bp, g1, be1 = pv[0:1, :], pv[1:2, :], pv[2:3, :]
    b1, b2 = pv[3:4, :], pv[4:5, :]
    g2, be2 = pv[5:6, :], pv[6:7, :]

    # ---- fused projections: one MXU push produces [Q | K | Vproj] ----
    # w_all = [Wq | Wk | Wvp] with Wvp[:, h*D:(h+1)*D] = Wv[:, h_slice] @ Wp[h_slice, :]
    qkv = jnp.dot(x, w_all_ref[...], preferred_element_type=jnp.float32)   # (rows, 2D + H*D)
    qkv3 = qkv.reshape(b_blk, seq_len, 2 * D + H * D)

    inv_scale = 1.0 / jnp.sqrt(jnp.float32(D_MODEL))  # module divides by sqrt(d_model)
    attn = None
    for h in range(H):  # static 4-way unroll over heads
        qh = qkv3[..., h * HD:(h + 1) * HD]                       # (b, T, HD)
        kh = qkv3[..., D + h * HD: D + (h + 1) * HD]              # (b, T, HD)
        vph = qkv3[..., 2 * D + h * D: 2 * D + (h + 1) * D]       # (b, T, D), V already x Wp slice
        # contract last dims directly -> no transposed copy of kh
        s = jnp.einsum('btd,bsd->bts', qh, kh,
                       preferred_element_type=jnp.float32) * inv_scale     # (b, T, T)
        s = s - jnp.max(s, axis=-1, keepdims=True)
        p = jnp.exp(s)
        # Exact normalization (approx reciprocal exceeded the accuracy budget here).
        p = p / jnp.sum(p, axis=-1, keepdims=True)
        ctx = jnp.einsum('bts,bse->bte', p, vph,
                         preferred_element_type=jnp.float32)               # (b, T, D)
        attn = ctx if attn is None else attn + ctx

    attn = attn.reshape(rows, D) + bp   # output-projection bias

    # ---- LayerNorm 1 + residual ----
    x1 = x + _layer_norm(attn, g1, be1)

    # ---- FeedForward: relu(x1 @ W1 + b1) @ W2 + b2 ----
    h1 = jnp.dot(x1, wff_ref[0], preferred_element_type=jnp.float32) + b1
    h1 = jnp.maximum(h1, 0.0)
    ff = jnp.dot(h1, wff_ref[1], preferred_element_type=jnp.float32) + b2

    # ---- LayerNorm 2 + residual ----
    o_ref[...] = x1 + _layer_norm(ff, g2, be2)


def _pick_batch_block(B, T, row_target=256):
    """Largest divisor of B with B_BLK*T <= row_target (keeps >=2 grid steps for big B,
    so both v7x TensorCores get work, while tiny B collapses to a single step)."""
    best = 1
    for d in range(1, B + 1):
        if B % d == 0 and d * T <= max(row_target, T):
            best = d
    return best


def encoder_block(x, params):
    (wq, wk, wv, wp, bp, g1, be1, w1, b1, w2, b2, g2, be2) = params
    B, T, D = x.shape
    assert D == D_MODEL

    # --- one-time weight fusion in the wrapper (weight-only transform) ---
    # (p_h @ (x @ Wv[:,hsl])) @ Wp[hsl,:] == p_h @ (x @ (Wv[:,hsl] @ Wp[hsl,:]))
    wvp = jnp.concatenate(
        [wv[:, h * HEAD_DIM:(h + 1) * HEAD_DIM] @ wp[h * HEAD_DIM:(h + 1) * HEAD_DIM, :]
         for h in range(NUM_HEADS)], axis=1)                               # (D, H*D)
    w_all = jnp.concatenate([wq, wk, wvp], axis=1)                         # (D, 2D + H*D)
    wff = jnp.stack([w1, w2], axis=0)                                      # (2, D, D)
    pvec = jnp.concatenate(
        [bp, g1, be1, b1, b2, g2, be2, jnp.zeros((1, D), jnp.float32)], axis=0)  # (8, D)

    b_blk = _pick_batch_block(B, T)
    rows_blk = b_blk * T
    n_steps = B // b_blk

    x2 = x.reshape(B * T, D)
    kernel = functools.partial(encoder_block_kernel, b_blk=b_blk, seq_len=T)

    out = pl.pallas_call(
        kernel,
        out_shape=jax.ShapeDtypeStruct((B * T, D), jnp.float32),
        grid_spec=pltpu.PrefetchScalarGridSpec(
            num_scalar_prefetch=0,
            grid=(n_steps,),
            in_specs=[
                pl.BlockSpec((rows_blk, D), lambda i: (i, 0)),
                pl.BlockSpec(w_all.shape, lambda i: (0, 0)),
                pl.BlockSpec(wff.shape, lambda i: (0, 0, 0)),
                pl.BlockSpec(pvec.shape, lambda i: (0, 0)),
            ],
            out_specs=pl.BlockSpec((rows_blk, D), lambda i: (i, 0)),
        ),
        compiler_params=pltpu.CompilerParams(dimension_semantics=("parallel",)),
    )(x2, w_all, wff, pvec)
    return out.reshape(B, T, D)


# ---------------- deterministic parameter construction ----------------
def make_params(key):
    D = D_MODEL
    ks = jax.random.split(key, 12)
    scale = 0.05
    wq = jax.random.normal(ks[0], (D, D), jnp.float32) * scale   # already "x @ W" form
    wk = jax.random.normal(ks[1], (D, D), jnp.float32) * scale
    wv = jax.random.normal(ks[2], (D, D), jnp.float32) * scale
    wp = jax.random.normal(ks[3], (D, D), jnp.float32) * scale
    bp = jax.random.normal(ks[4], (1, D), jnp.float32) * scale
    g1 = 1.0 + jax.random.normal(ks[5], (1, D), jnp.float32) * scale
    be1 = jax.random.normal(ks[6], (1, D), jnp.float32) * scale
    w1 = jax.random.normal(ks[7], (D, D), jnp.float32) * scale
    b1 = jax.random.normal(ks[8], (1, D), jnp.float32) * scale
    w2 = jax.random.normal(ks[9], (D, D), jnp.float32) * scale
    b2 = jax.random.normal(ks[10], (1, D), jnp.float32) * scale
    g2 = 1.0 + jax.random.normal(ks[11], (1, D), jnp.float32) * scale
    be2 = jnp.zeros((1, D), jnp.float32)
    return [wq, wk, wv, wp, bp, g1, be1, w1, b1, w2, b2, g2, be2]


# ---------------- pure-JAX reference for verification ----------------
def reference(x, params):
    (wq, wk, wv, wp, bp, g1, be1, w1, b1, w2, b2, g2, be2) = params
    q = x @ wq
    k = x @ wk
    v = x @ wv
    outs = []
    for h in range(NUM_HEADS):
        sl = slice(h * HEAD_DIM, (h + 1) * HEAD_DIM)
        s = jnp.einsum("btd,bsd->bts", q[..., sl], k[..., sl]) / jnp.sqrt(jnp.float32(D_MODEL))
        p = jax.nn.softmax(s, axis=-1)
        outs.append(jnp.einsum("bts,bsd->btd", p, v[..., sl]))
    attn = jnp.concatenate(outs, axis=-1) @ wp + bp

    def ln(a, g, be):
        mu = jnp.mean(a, axis=-1, keepdims=True)
        var = jnp.mean((a - mu) ** 2, axis=-1, keepdims=True)
        return (a - mu) / jnp.sqrt(var + LN_EPS) * g + be

    x1 = x + ln(attn, g1, be1)
    ff = jnp.maximum(x1 @ w1 + b1, 0.0) @ w2 + b2
    return x1 + ln(ff, g2, be2)


if __name__ == "__main__":
    key = jax.random.PRNGKey(0)
    k_x, k_p, k_x2 = jax.random.split(key, 3)
    params = make_params(k_p)

    # Tiny case matching the toy config (B=2, T=8, d_model=32) -> single grid step.
    x_small = jax.random.normal(k_x, (2, 8, D_MODEL), jnp.float32)
    out_small = jax.block_until_ready(encoder_block(x_small, params))
    ref_small = reference(x_small, params)

    # Larger batch exercising multi-sequence row blocks and a multi-step ("parallel") grid.
    x_large = jax.random.normal(k_x2, (64, 8, D_MODEL), jnp.float32)
    out_large = jax.block_until_ready(encoder_block(x_large, params))
    ref_large = reference(x_large, params)

    for out, ref in ((out_small, ref_small), (out_large, ref_large)):
        assert out.shape == ref.shape
        # Softmax is now exact; remaining deviation is f32 reassociation from the fused
        # (Wv@Wp) weights and MXU accumulation order — a few ulps, well under 2e-3.
        assert jnp.allclose(out, ref, atol=2e-3, rtol=2e-3), (
            f"max abs err {jnp.max(jnp.abs(out - ref))}"
        )
    print("KERNEL_OK")
</pallas_src>

<mosaic_0001>
module attributes {stable_mosaic.version = 11 : i64} {
  func.func @encoder_block_kernel(%arg0: i32, %arg1: memref<16x32xf32, #tpu.memory_space<vmem>>, %arg2: memref<32x192xf32, #tpu.memory_space<vmem>>, %arg3: memref<2x32x32xf32, #tpu.memory_space<vmem>>, %arg4: memref<8x32xf32, #tpu.memory_space<vmem>>, %arg5: memref<16x32xf32, #tpu.memory_space<vmem>>) attributes {dimension_semantics = [#tpu.dimension_semantics<parallel>], iteration_bounds = array<i64: 1>, scalar_prefetch = 0 : i64, scratch_operands = 0 : i64, tpu.core_type = #tpu.core_type<tc>, window_params = [{transform_indices = @transform_0, window_bounds = array<i64: 16, 32>}, {pipeline_mode = #tpu.pipeline_mode<synchronous>, transform_indices = @transform_1, window_bounds = array<i64: 32, 192>}, {pipeline_mode = #tpu.pipeline_mode<synchronous>, transform_indices = @transform_2, window_bounds = array<i64: 2, 32, 32>}, {pipeline_mode = #tpu.pipeline_mode<synchronous>, transform_indices = @transform_3, window_bounds = array<i64: 8, 32>}, {transform_indices = @transform_4, window_bounds = array<i64: 16, 32>}]} {
    %c0 = arith.constant 0 : index
    %c0_0 = arith.constant 0 : index
    %0 = vector.load %arg1[%c0, %c0_0] : memref<16x32xf32, #tpu.memory_space<vmem>>, vector<16x32xf32>
    %c0_1 = arith.constant 0 : index
    %c0_2 = arith.constant 0 : index
    %1 = vector.load %arg4[%c0_1, %c0_2] : memref<8x32xf32, #tpu.memory_space<vmem>>, vector<8x32xf32>
    %2 = vector.extract_strided_slice %1 {offsets = [0, 0], sizes = [1, 32], strides = [1, 1]} : vector<8x32xf32> to vector<1x32xf32>
    %3 = vector.extract_strided_slice %1 {offsets = [1, 0], sizes = [1, 32], strides = [1, 1]} : vector<8x32xf32> to vector<1x32xf32>
    %4 = vector.extract_strided_slice %1 {offsets = [2, 0], sizes = [1, 32], strides = [1, 1]} : vector<8x32xf32> to vector<1x32xf32>
    %5 = vector.extract_strided_slice %1 {offsets = [3, 0], sizes = [1, 32], strides = [1, 1]} : vector<8x32xf32> to vector<1x32xf32>
    %6 = vector.extract_strided_slice %1 {offsets = [4, 0], sizes = [1, 32], strides = [1, 1]} : vector<8x32xf32> to vector<1x32xf32>
    %7 = vector.extract_strided_slice %1 {offsets = [5, 0], sizes = [1, 32], strides = [1, 1]} : vector<8x32xf32> to vector<1x32xf32>
    %8 = vector.extract_strided_slice %1 {offsets = [6, 0], sizes = [1, 32], strides = [1, 1]} : vector<8x32xf32> to vector<1x32xf32>
    %c0_3 = arith.constant 0 : index
    %c0_4 = arith.constant 0 : index
    %9 = vector.load %arg2[%c0_3, %c0_4] : memref<32x192xf32, #tpu.memory_space<vmem>>, vector<32x192xf32>
    %cst = arith.constant dense<0.000000e+00> : vector<16x192xf32>
    %10 = tpu.matmul %0, %9, %cst {dimension_numbers = #tpu.dot_dimension_numbers<[1], [0], [0], [1], [0, 0, 1, 1], [], []>} : vector<16x32xf32>, vector<32x192xf32>, vector<16x192xf32> -> vector<16x192xf32>
    %11 = vector.shape_cast %10 : vector<16x192xf32> to vector<2x8x192xf32>
    %cst_5 = arith.constant 3.200000e+01 : f32
    %12 = math.sqrt %cst_5 : f32
    %cst_6 = arith.constant 1.000000e+00 : f32
    %13 = arith.divf %cst_6, %12 : f32
    %14 = vector.extract_strided_slice %11 {offsets = [0, 0, 0], sizes = [2, 8, 8], strides = [1, 1, 1]} : vector<2x8x192xf32> to vector<2x8x8xf32>
    %15 = vector.extract_strided_slice %11 {offsets = [0, 0, 32], sizes = [2, 8, 8], strides = [1, 1, 1]} : vector<2x8x192xf32> to vector<2x8x8xf32>
    %16 = vector.extract_strided_slice %11 {offsets = [0, 0, 64], sizes = [2, 8, 32], strides = [1, 1, 1]} : vector<2x8x192xf32> to vector<2x8x32xf32>
    "tpu.trace_start"() <{level = 10 : i32, message = "btd,bsd->bts"}> : () -> ()
    %cst_7 = arith.constant dense<0.000000e+00> : vector<2x8x8xf32>
    %17 = tpu.matmul %14, %15, %cst_7 {dimension_numbers = #tpu.dot_dimension_numbers<[2], [2], [1], [1], [0, 0, 0, 1, 1, 1], [0], [0]>} : vector<2x8x8xf32>, vector<2x8x8xf32>, vector<2x8x8xf32> -> vector<2x8x8xf32>
    "tpu.trace_stop"() : () -> ()
    %18 = vector.broadcast %13 : f32 to vector<2x8x8xf32>
    %19 = arith.mulf %17, %18 : vector<2x8x8xf32>
    %cst_8 = arith.constant dense<0xFF800000> : vector<2x8xf32>
    %20 = vector.multi_reduction <maximumf>, %19, %cst_8 [2] : vector<2x8x8xf32> to vector<2x8xf32>
    %21 = vector.shape_cast %20 : vector<2x8xf32> to vector<2x8x1xf32>
    %22 = vector.broadcast %21 : vector<2x8x1xf32> to vector<2x8x8xf32>
    %23 = arith.subf %19, %22 : vector<2x8x8xf32>
    %24 = math.exp %23 : vector<2x8x8xf32>
    %cst_9 = arith.constant dense<0.000000e+00> : vector<2x8xf32>
    %25 = vector.multi_reduction <add>, %24, %cst_9 [2] : vector<2x8x8xf32> to vector<2x8xf32>
    %26 = vector.shape_cast %25 : vector<2x8xf32> to vector<2x8x1xf32>
    %27 = vector.broadcast %26 : vector<2x8x1xf32> to vector<2x8x8xf32>
    %28 = arith.divf %24, %27 : vector<2x8x8xf32>
    "tpu.trace_start"() <{level = 10 : i32, message = "bts,bse->bte"}> : () -> ()
    %cst_10 = arith.constant dense<0.000000e+00> : vector<2x8x32xf32>
    %29 = tpu.matmul %28, %16, %cst_10 {dimension_numbers = #tpu.dot_dimension_numbers<[2], [1], [1], [2], [0, 0, 0, 1, 1, 2], [0], [0]>} : vector<2x8x8xf32>, vector<2x8x32xf32>, vector<2x8x32xf32> -> vector<2x8x32xf32>
    "tpu.trace_stop"() : () -> ()
    %30 = vector.extract_strided_slice %11 {offsets = [0, 0, 8], sizes = [2, 8, 8], strides = [1, 1, 1]} : vector<2x8x192xf32> to vector<2x8x8xf32>
    %31 = vector.extract_strided_slice %11 {offsets = [0, 0, 40], sizes = [2, 8, 8], strides = [1, 1, 1]} : vector<2x8x192xf32> to vector<2x8x8xf32>
    %32 = vector.extract_strided_slice %11 {offsets = [0, 0, 96], sizes = [2, 8, 32], strides = [1, 1, 1]} : vector<2x8x192xf32> to vector<2x8x32xf32>
    "tpu.trace_start"() <{level = 10 : i32, message = "btd,bsd->bts"}> : () -> ()
    %cst_11 = arith.constant dense<0.000000e+00> : vector<2x8x8xf32>
    %33 = tpu.matmul %30, %31, %cst_11 {dimension_numbers = #tpu.dot_dimension_numbers<[2], [2], [1], [1], [0, 0, 0, 1, 1, 1], [0], [0]>} : vector<2x8x8xf32>, vector<2x8x8xf32>, vector<2x8x8xf32> -> vector<2x8x8xf32>
    "tpu.trace_stop"() : () -> ()
    %34 = vector.broadcast %13 : f32 to vector<2x8x8xf32>
    %35 = arith.mulf %33, %34 : vector<2x8x8xf32>
    %cst_12 = arith.constant dense<0xFF800000> : vector<2x8xf32>
    %36 = vector.multi_reduction <maximumf>, %35, %cst_12 [2] : vector<2x8x8xf32> to vector<2x8xf32>
    %37 = vector.shape_cast %36 : vector<2x8xf32> to vector<2x8x1xf32>
    %38 = vector.broadcast %37 : vector<2x8x1xf32> to vector<2x8x8xf32>
    %39 = arith.subf %35, %38 : vector<2x8x8xf32>
    %40 = math.exp %39 : vector<2x8x8xf32>
    %cst_13 = arith.constant dense<0.000000e+00> : vector<2x8xf32>
    %41 = vector.multi_reduction <add>, %40, %cst_13 [2] : vector<2x8x8xf32> to vector<2x8xf32>
    %42 = vector.shape_cast %41 : vector<2x8xf32> to vector<2x8x1xf32>
    %43 = vector.broadcast %42 : vector<2x8x1xf32> to vector<2x8x8xf32>
    %44 = arith.divf %40, %43 : vector<2x8x8xf32>
    "tpu.trace_start"() <{level = 10 : i32, message = "bts,bse->bte"}> : () -> ()
    %cst_14 = arith.constant dense<0.000000e+00> : vector<2x8x32xf32>
    %45 = tpu.matmul %44, %32, %cst_14 {dimension_numbers = #tpu.dot_dimension_numbers<[2], [1], [1], [2], [0, 0, 0, 1, 1, 2], [0], [0]>} : vector<2x8x8xf32>, vector<2x8x32xf32>, vector<2x8x32xf32> -> vector<2x8x32xf32>
    "tpu.trace_stop"() : () -> ()
    %46 = arith.addf %29, %45 : vector<2x8x32xf32>
    %47 = vector.extract_strided_slice %11 {offsets = [0, 0, 16], sizes = [2, 8, 8], strides = [1, 1, 1]} : vector<2x8x192xf32> to vector<2x8x8xf32>
    %48 = vector.extract_strided_slice %11 {offsets = [0, 0, 48], sizes = [2, 8, 8], strides = [1, 1, 1]} : vector<2x8x192xf32> to vector<2x8x8xf32>
    %49 = vector.extract_strided_slice %11 {offsets = [0, 0, 128], sizes = [2, 8, 32], strides = [1, 1, 1]} : vector<2x8x192xf32> to vector<2x8x32xf32>
    "tpu.trace_start"() <{level = 10 : i32, message = "btd,bsd->bts"}> : () -> ()
    %cst_15 = arith.constant dense<0.000000e+00> : vector<2x8x8xf32>
    %50 = tpu.matmul %47, %48, %cst_15 {dimension_numbers = #tpu.dot_dimension_numbers<[2], [2], [1], [1], [0, 0, 0, 1, 1, 1], [0], [0]>} : vector<2x8x8xf32>, vector<2x8x8xf32>, vector<2x8x8xf32> -> vector<2x8x8xf32>
    "tpu.trace_stop"() : () -> ()
    %51 = vector.broadcast %13 : f32 to vector<2x8x8xf32>
    %52 = arith.mulf %50, %51 : vector<2x8x8xf32>
    %cst_16 = arith.constant dense<0xFF800000> : vector<2x8xf32>
    %53 = vector.multi_reduction <maximumf>, %52, %cst_16 [2] : vector<2x8x8xf32> to vector<2x8xf32>
    %54 = vector.shape_cast %53 : vector<2x8xf32> to vector<2x8x1xf32>
    %55 = vector.broadcast %54 : vector<2x8x1xf32> to vector<2x8x8xf32>
    %56 = arith.subf %52, %55 : vector<2x8x8xf32>
    %57 = math.exp %56 : vector<2x8x8xf32>
    %cst_17 = arith.constant dense<0.000000e+00> : vector<2x8xf32>
    %58 = vector.multi_reduction <add>, %57, %cst_17 [2] : vector<2x8x8xf32> to vector<2x8xf32>
    %59 = vector.shape_cast %58 : vector<2x8xf32> to vector<2x8x1xf32>
    %60 = vector.broadcast %59 : vector<2x8x1xf32> to vector<2x8x8xf32>
    %61 = arith.divf %57, %60 : vector<2x8x8xf32>
    "tpu.trace_start"() <{level = 10 : i32, message = "bts,bse->bte"}> : () -> ()
    %cst_18 = arith.constant dense<0.000000e+00> : vector<2x8x32xf32>
    %62 = tpu.matmul %61, %49, %cst_18 {dimension_numbers = #tpu.dot_dimension_numbers<[2], [1], [1], [2], [0, 0, 0, 1, 1, 2], [0], [0]>} : vector<2x8x8xf32>, vector<2x8x32xf32>, vector<2x8x32xf32> -> vector<2x8x32xf32>
    "tpu.trace_stop"() : () -> ()
    %63 = arith.addf %46, %62 : vector<2x8x32xf32>
    %64 = vector.extract_strided_slice %11 {offsets = [0, 0, 24], sizes = [2, 8, 8], strides = [1, 1, 1]} : vector<2x8x192xf32> to vector<2x8x8xf32>
    %65 = vector.extract_strided_slice %11 {offsets = [0, 0, 56], sizes = [2, 8, 8], strides = [1, 1, 1]} : vector<2x8x192xf32> to vector<2x8x8xf32>
    %66 = vector.extract_strided_slice %11 {offsets = [0, 0, 160], sizes = [2, 8, 32], strides = [1, 1, 1]} : vector<2x8x192xf32> to vector<2x8x32xf32>
    "tpu.trace_start"() <{level = 10 : i32, message = "btd,bsd->bts"}> : () -> ()
    %cst_19 = arith.constant dense<0.000000e+00> : vector<2x8x8xf32>
    %67 = tpu.matmul %64, %65, %cst_19 {dimension_numbers = #tpu.dot_dimension_numbers<[2], [2], [1], [1], [0, 0, 0, 1, 1, 1], [0], [0]>} : vector<2x8x8xf32>, vector<2x8x8xf32>, vector<2x8x8xf32> -> vector<2x8x8xf32>
    "tpu.trace_stop"() : () -> ()
    %68 = vector.broadcast %13 : f32 to vector<2x8x8xf32>
    %69 = arith.mulf %67, %68 : vector<2x8x8xf32>
    %cst_20 = arith.constant dense<0xFF800000> : vector<2x8xf32>
    %70 = vector.multi_reduction <maximumf>, %69, %cst_20 [2] : vector<2x8x8xf32> to vector<2x8xf32>
    %71 = vector.shape_cast %70 : vector<2x8xf32> to vector<2x8x1xf32>
    %72 = vector.broadcast %71 : vector<2x8x1xf32> to vector<2x8x8xf32>
    %73 = arith.subf %69, %72 : vector<2x8x8xf32>
    %74 = math.exp %73 : vector<2x8x8xf32>
    %cst_21 = arith.constant dense<0.000000e+00> : vector<2x8xf32>
    %75 = vector.multi_reduction <add>, %74, %cst_21 [2] : vector<2x8x8xf32> to vector<2x8xf32>
    %76 = vector.shape_cast %75 : vector<2x8xf32> to vector<2x8x1xf32>
    %77 = vector.broadcast %76 : vector<2x8x1xf32> to vector<2x8x8xf32>
    %78 = arith.divf %74, %77 : vector<2x8x8xf32>
    "tpu.trace_start"() <{level = 10 : i32, message = "bts,bse->bte"}> : () -> ()
    %cst_22 = arith.constant dense<0.000000e+00> : vector<2x8x32xf32>
    %79 = tpu.matmul %78, %66, %cst_22 {dimension_numbers = #tpu.dot_dimension_numbers<[2], [1], [1], [2], [0, 0, 0, 1, 1, 2], [0], [0]>} : vector<2x8x8xf32>, vector<2x8x32xf32>, vector<2x8x32xf32> -> vector<2x8x32xf32>
    "tpu.trace_stop"() : () -> ()
    %80 = arith.addf %63, %79 : vector<2x8x32xf32>
    %81 = vector.shape_cast %80 : vector<2x8x32xf32> to vector<16x32xf32>
    %82 = vector.broadcast %2 : vector<1x32xf32> to vector<16x32xf32>
    %83 = arith.addf %81, %82 : vector<16x32xf32>
    %cst_23 = arith.constant dense<0.000000e+00> : vector<16xf32>
    %84 = vector.multi_reduction <add>, %83, %cst_23 [1] : vector<16x32xf32> to vector<16xf32>
    %85 = vector.shape_cast %84 : vector<16xf32> to vector<16x1xf32>
    %cst_24 = arith.constant 3.200000e+01 : f32
    %86 = vector.broadcast %cst_24 : f32 to vector<16x1xf32>
    %87 = arith.divf %85, %86 : vector<16x1xf32>
    %88 = vector.broadcast %87 : vector<16x1xf32> to vector<16x32xf32>
    %89 = arith.subf %83, %88 : vector<16x32xf32>
    %90 = arith.mulf %89, %89 : vector<16x32xf32>
    %cst_25 = arith.constant dense<0.000000e+00> : vector<16xf32>
    %91 = vector.multi_reduction <add>, %90, %cst_25 [1] : vector<16x32xf32> to vector<16xf32>
    %92 = vector.shape_cast %91 : vector<16xf32> to vector<16x1xf32>
    %cst_26 = arith.constant 3.200000e+01 : f32
    %93 = vector.broadcast %cst_26 : f32 to vector<16x1xf32>
    %94 = arith.divf %92, %93 : vector<16x1xf32>
    %95 = vector.broadcast %87 : vector<16x1xf32> to vector<16x32xf32>
    %96 = arith.subf %83, %95 : vector<16x32xf32>
    %cst_27 = arith.constant 9.99999974E-6 : f32
    %97 = vector.broadcast %cst_27 : f32 to vector<16x1xf32>
    %98 = arith.addf %94, %97 : vector<16x1xf32>
    %99 = math.rsqrt %98 : vector<16x1xf32>
    %100 = vector.broadcast %99 : vector<16x1xf32> to vector<16x32xf32>
    %101 = arith.mulf %96, %100 : vector<16x32xf32>
    %102 = vector.broadcast %3 : vector<1x32xf32> to vector<16x32xf32>
    %103 = arith.mulf %101, %102 : vector<16x32xf32>
    %104 = vector.broadcast %4 : vector<1x32xf32> to vector<16x32xf32>
    %105 = arith.addf %103, %104 : vector<16x32xf32>
    %106 = arith.addf %0, %105 : vector<16x32xf32>
    %c0_28 = arith.constant 0 : index
    %c0_29 = arith.constant 0 : index
    %c0_30 = arith.constant 0 : index
    %107 = vector.load %arg3[%c0_28, %c0_29, %c0_30] : memref<2x32x32xf32, #tpu.memory_space<vmem>>, vector<1x32x32xf32>
    %108 = vector.shape_cast %107 : vector<1x32x32xf32> to vector<32x32xf32>
    %cst_31 = arith.constant dense<0.000000e+00> : vector<16x32xf32>
    %109 = tpu.matmul %106, %108, %cst_31 {dimension_numbers = #tpu.dot_dimension_numbers<[1], [0], [0], [1], [0, 0, 1, 1], [], []>} : vector<16x32xf32>, vector<32x32xf32>, vector<16x32xf32> -> vector<16x32xf32>
    %110 = vector.broadcast %5 : vector<1x32xf32> to vector<16x32xf32>
    %111 = arith.addf %109, %110 : vector<16x32xf32>
    %cst_32 = arith.constant 0.000000e+00 : f32
    %112 = vector.broadcast %cst_32 : f32 to vector<16x32xf32>
    %113 = arith.maximumf %111, %112 : vector<16x32xf32>
    %c1 = arith.constant 1 : index
    %c0_33 = arith.constant 0 : index
    %c0_34 = arith.constant 0 : index
    %114 = vector.load %arg3[%c1, %c0_33, %c0_34] : memref<2x32x32xf32, #tpu.memory_space<vmem>>, vector<1x32x32xf32>
    %115 = vector.shape_cast %114 : vector<1x32x32xf32> to vector<32x32xf32>
    %cst_35 = arith.constant dense<0.000000e+00> : vector<16x32xf32>
    %116 = tpu.matmul %113, %115, %cst_35 {dimension_numbers = #tpu.dot_dimension_numbers<[1], [0], [0], [1], [0, 0, 1, 1], [], []>} : vector<16x32xf32>, vector<32x32xf32>, vector<16x32xf32> -> vector<16x32xf32>
    %117 = vector.broadcast %6 : vector<1x32xf32> to vector<16x32xf32>
    %118 = arith.addf %116, %117 : vector<16x32xf32>
    %cst_36 = arith.constant dense<0.000000e+00> : vector<16xf32>
    %119 = vector.multi_reduction <add>, %118, %cst_36 [1] : vector<16x32xf32> to vector<16xf32>
    %120 = vector.shape_cast %119 : vector<16xf32> to vector<16x1xf32>
    %cst_37 = arith.constant 3.200000e+01 : f32
    %121 = vector.broadcast %cst_37 : f32 to vector<16x1xf32>
    %122 = arith.divf %120, %121 : vector<16x1xf32>
    %123 = vector.broadcast %122 : vector<16x1xf32> to vector<16x32xf32>
    %124 = arith.subf %118, %123 : vector<16x32xf32>
    %125 = arith.mulf %124, %124 : vector<16x32xf32>
    %cst_38 = arith.constant dense<0.000000e+00> : vector<16xf32>
    %126 = vector.multi_reduction <add>, %125, %cst_38 [1] : vector<16x32xf32> to vector<16xf32>
    %127 = vector.shape_cast %126 : vector<16xf32> to vector<16x1xf32>
    %cst_39 = arith.constant 3.200000e+01 : f32
    %128 = vector.broadcast %cst_39 : f32 to vector<16x1xf32>
    %129 = arith.divf %127, %128 : vector<16x1xf32>
    %130 = vector.broadcast %122 : vector<16x1xf32> to vector<16x32xf32>
    %131 = arith.subf %118, %130 : vector<16x32xf32>
    %cst_40 = arith.constant 9.99999974E-6 : f32
    %132 = vector.broadcast %cst_40 : f32 to vector<16x1xf32>
    %133 = arith.addf %129, %132 : vector<16x1xf32>
    %134 = math.rsqrt %133 : vector<16x1xf32>
    %135 = vector.broadcast %134 : vector<16x1xf32> to vector<16x32xf32>
    %136 = arith.mulf %131, %135 : vector<16x32xf32>
    %137 = vector.broadcast %7 : vector<1x32xf32> to vector<16x32xf32>
    %138 = arith.mulf %136, %137 : vector<16x32xf32>
    %139 = vector.broadcast %8 : vector<1x32xf32> to vector<16x32xf32>
    %140 = arith.addf %138, %139 : vector<16x32xf32>
    %141 = arith.addf %106, %140 : vector<16x32xf32>
    %c0_41 = arith.constant 0 : index
    %c0_42 = arith.constant 0 : index
    %142 = vector.load %arg5[%c0_41, %c0_42] : memref<16x32xf32, #tpu.memory_space<vmem>>, vector<16x32xf32>
    tpu.vector_store %arg5[%c0_41, %c0_42], %141 {strides = array<i32>} : memref<16x32xf32, #tpu.memory_space<vmem>>, vector<16x32xf32>,
    return
  }
  func.func @transform_0(%arg0: i32) -> (i32, i32) {
    %c0_i32 = arith.constant 0 : i32
    %c0_i32_0 = arith.constant 0 : i32
    return %arg0, %c0_i32 : i32, i32
  }
  func.func @transform_1(%arg0: i32) -> (i32, i32) {
    %c0_i32 = arith.constant 0 : i32
    %c0_i32_0 = arith.constant 0 : i32
    %c0_i32_1 = arith.constant 0 : i32
    return %c0_i32, %c0_i32_0 : i32, i32
  }
  func.func @transform_2(%arg0: i32) -> (i32, i32, i32) {
    %c0_i32 = arith.constant 0 : i32
    %c0_i32_0 = arith.constant 0 : i32
    %c0_i32_1 = arith.constant 0 : i32
    %c0_i32_2 = arith.constant 0 : i32
    return %c0_i32, %c0_i32_0, %c0_i32_1 : i32, i32, i32
  }
  func.func @transform_3(%arg0: i32) -> (i32, i32) {
    %c0_i32 = arith.constant 0 : i32
    %c0_i32_0 = arith.constant 0 : i32
    %c0_i32_1 = arith.constant 0 : i32
    return %c0_i32, %c0_i32_0 : i32, i32
  }
  func.func @transform_4(%arg0: i32) -> (i32, i32) {
    %c0_i32 = arith.constant 0 : i32
    %c0_i32_0 = arith.constant 0 : i32
    return %arg0, %c0_i32 : i32, i32
  }
}

</mosaic_0001>

<bundles_post_ra>
// kernel: tpu_custom_call.1
= control target key start
LH: loop header
LB: loop body
LE: loop exit
PB: predicated region body
PF: predicated region fallthrough
CT: control target
= control target key end

     0   :  { %9 = vsyncpa [#allocation3], 0  ;;  %s2373_s0 = inlined_call_operand.hbm [shape: f32[16,32], index: 0, kind: input, shape index: {}]   ;;  %s2374_s1 = inlined_call_operand.hbm [shape: f32[32,192], index: 1, kind: input, shape index: {}]   ;;  %s2375_s2 = inlined_call_operand.hbm [shape: f32[2,32,32], index: 2, kind: input, shape index: {}]   ;;  %s2376_s3 = inlined_call_operand.hbm [shape: f32[8,32], index: 3, kind: input, shape index: {}]   ;;  %s2377_s4 = inlined_call_operand.hbm [shape: f32[16,32], index: 4, kind: output, shape index: {}]  }
   0x1   :  { %10 = vsyncpa [#allocation6], 0 }
   0x2   :  { %11 = vsyncpa [#allocation9], 0 }
   0x3   :  { %12 = vsyncpa [#allocation4], 0  ;;  %s2126_s15 = smov [#allocation5]  }
   0x4   :  { %s30_s16 = sshll.u32 %s2126_s15, 4  ;;  %s31_s16 = int_to_ptr.vmem [resolvable:$true] %s30_s16 }
   0x5   :  { %s2026_s17 = scalar_lea.vmem %s31_s16, 1024  ;;  %p2031_p1 = scmp.lt.s32.totalorder %s31_s16, %s31_s16 }
   0x6   :  { %p2027_p0 = scmp.ne.s32.totalorder %s31_s16, %s2026_s17  ;;  %p2032_p2 = scmp.lt.s32.totalorder %s2026_s17, %s2026_s17 }
   0x8   :  { %p2033_p3 = por %p2032_p2, %p2031_p1 }
   0xa   :  { %p2034_p4 = pnand %p2033_p3, %p2027_p0 }
   0xc   :  { %2037 = shalt.err (!%p2034_p4)
}
   0xd   :  { %s2127_s18 = smov 256   ;;  %s2128_s19 = smov 16  }
   0xe   :  { %36 = dma.hbm_to_vmem [thread:$0]  %s2374_s1, 1024, %s31_s16, [#allocation6], %s2127_s18, %s2127_s18, %s2128_s19  }
   0xf   :  { %s2129_s22 = smov [#allocation2]  }
  0x10   :  { %s18_s23 = sshll.u32 %s2129_s22, 4  ;;  %s19_s23 = int_to_ptr.vmem [resolvable:$true] %s18_s23 }
  0x11   :  { %s2046_s24 = scalar_lea.vmem %s19_s23, 256  ;;  %p2051_p6 = scmp.lt.s32.totalorder %s19_s23, %s19_s23 }
  0x12   :  { %p2047_p5 = scmp.ne.s32.totalorder %s19_s23, %s2046_s24  ;;  %p2052_p7 = scmp.lt.s32.totalorder %s2046_s24, %s2046_s24 }
  0x14   :  { %p2053_p8 = por %p2052_p7, %p2051_p6 }
  0x16   :  { %p2054_p9 = pnand %p2053_p8, %p2047_p5 }
  0x18   :  { %2057 = shalt.err (!%p2054_p9)
}
  0x19   :  { %s2130_s25 = smov 128   ;;  %s2131_s26 = smov 8  }
  0x1a   :  { %24 = dma.hbm_to_vmem [thread:$0]  %s2373_s0, 256, %s19_s23, [#allocation3], %s2130_s25, %s2130_s25, %s2131_s26  }
  0x1b   :  { %s2132_s1 = smov [#allocation7]   ;;  %s2133_s30 = smov [#allocation8]  }
  0x1c   :  { %s42_s29 = sshll.u32 %s2132_s1, 4  ;;  %s55_s5 = sshll.u32 %s2133_s30, 4  ;;  %s43_s29 = int_to_ptr.vmem [resolvable:$true] %s42_s29  ;;  %s56_s5 = int_to_ptr.vmem [resolvable:$true] %s55_s5 }
  0x1d   :  { %s2066_s6 = scalar_lea.vmem %s43_s29, 1024  ;;  %p2071_p11 = scmp.lt.s32.totalorder %s43_s29, %s43_s29 }
  0x1e   :  { %p2067_p10 = scmp.ne.s32.totalorder %s43_s29, %s2066_s6  ;;  %p2072_p12 = scmp.lt.s32.totalorder %s2066_s6, %s2066_s6 }
  0x20   :  { %p2073_p13 = por %p2072_p12, %p2071_p11 }
  0x22   :  { %p2074_p0 = pnand %p2073_p13, %p2067_p10 }
  0x24   :  { %2077 = shalt.err (!%p2074_p0)
}
  0x25   :  { %48 = dma.hbm_to_vmem [thread:$0]  %s2375_s2, 1024, %s43_s29, [#allocation6], %s2130_s25, %s2130_s25, %s2131_s26  }
  0x26   :  { %s2086_s0 = scalar_lea.vmem %s56_s5, 128  ;;  %p2091_p2 = scmp.lt.s32.totalorder %s56_s5, %s56_s5 }
  0x27   :  { %p2087_p1 = scmp.ne.s32.totalorder %s56_s5, %s2086_s0  ;;  %p2092_p3 = scmp.lt.s32.totalorder %s2086_s0, %s2086_s0 }
  0x29   :  { %p2093_p4 = por %p2092_p3, %p2091_p2 }
  0x2b   :  { %p2094_p5 = pnand %p2093_p4, %p2087_p1 }
  0x2d   :  { %2097 = shalt.err (!%p2094_p5)
}
  0x2e   :  { %58 = dma.hbm_to_vmem [thread:$0]  %s2376_s3, 128, %s56_s5, [#allocation9]  }
  0x2f   :  { %2118 = dma.done.wait [#allocation3], 256  }
  0x30   :  { %2119 = vsyncadd [#allocation3], 4294967040 }
  0x31   :  { %2120 = dma.done.wait [#allocation6], 2048  }
  0x32   :  { %2121 = vsyncadd [#allocation6], 4294965248 }
  0x33   :  { %2122 = dma.done.wait [#allocation9], 128  }
  0x34   :  { %2123 = vsyncadd [#allocation9], 4294967168  ;;  %v2134_v0 = vmov 0.0   ;;  %v81_v1 = vld [vmem:[#allocation5 + $0x38] sm:$0xff]  ;;  %v80_v2 = vld [vmem:[#allocation5 + $0x30] sm:$0xff]  ;;  %vm82_vm0 = vcmask 261120  }
  0x35   :  { %153 = vmatprep.mubr.f32.mxu0 %v2134_v0  ;;  %1856 = vmatprep.subr.mxu1 %v2134_v0  ;;  %v79_v3 = vld [vmem:[#allocation5 + $0x28] sm:$0xff]  ;;  %v78_v4 = vld [vmem:[#allocation5 + $0x20] sm:$0xff]  ;;  %v77_v5 = vld [vmem:[#allocation5 + $0x18] sm:$0xff]  ;;  %vm2135_vm1 = vmmov 0   ;;  %s2136_s2 = smov 88   ;;  %s2137_s3 = smov 96  }
  0x36   :  { %113 = vmatprep.subr.mxu0 %v81_v1  ;;  %v76_v6 = vld [vmem:[#allocation5 + $0x10] sm:$0xff]  ;;  %v75_v7 = vld [vmem:[#allocation5 + $0x8] sm:$0xff]  ;;  %v74_v8 = vld [vmem:[#allocation5] sm:$0xff]  ;;  %1858 = vmatprep.mubr.msk.f32.mxu1 %vm2135_vm1, %v2134_v0  ;;  %s2138_s11 = smov 120   ;;  %vm169_vm2 = vcmask 64512   ;;  %s2139_s12 = smov 32  }
  0x37   :  { %114 = vmatpush1.msra.mxu0 %v80_v2  ;;  %v2191_v9 = vld [vmem:[#allocation2] sm:$0xff]  ;;  %v2197_v10 = vld [vmem:[#allocation2 + $0x8] sm:$0xff]  ;;  %s2140_s13 = smov 64   ;;  %s2141_s14 = smov 80  }
  0x38   :  { %115 = vmatprep.subr.mxu0 %v79_v3  ;;  %s2142_s15 = smov 112   ;;  %s2143_s16 = smov 72  }
  0x39   :  { %116 = vmatpush1.msra.mxu0 %v78_v4  ;;  %s2144_s17 = smov 104   ;;  %s2145_s18 = smov [#allocation10]  }
  0x3a   :  { %117 = vmatprep.subr.mxu0 %v77_v5  ;;  %s1768_s19 = sshll.u32 %s2145_s18, 4  ;;  %s1769_s19 = int_to_ptr.vmem [resolvable:$true] %s1768_s19 }
  0x3b   :  { %118 = vmatpush1.msra.mxu0 %v76_v6  ;;  %s2098_s20 = scalar_lea.vmem %s1769_s19, 256  ;;  %p2103_p7 = scmp.lt.s32.totalorder %s1769_s19, %s1769_s19 }
  0x3c   :  { %119 = vmatprep.subr.mxu0 %v75_v7  ;;  %p2099_p6 = scmp.ne.s32.totalorder %s1769_s19, %s2098_s20  ;;  %p2104_p8 = scmp.lt.s32.totalorder %s2098_s20, %s2098_s20 }
  0x3d   :  { %120 = vmatpush1.msra.mxu0 %v74_v8 }
  0x3e   :  { %1782 = vmatmul.mubr.msk.f32.vlgmr.msra.gmra.mxu0 %vm82_vm0, %v2191_v9  ;;  %1871 = vmatprep.subr.mxu0 %v2134_v0  ;;  %p2105_p9 = por %p2104_p8, %p2103_p7 }
  0x3f   :  { %159 = vmatprep.mubr.f32.mxu0 %v2134_v0 }
  0x40   :  { %p2106_p10 = pnand %p2105_p9, %p2099_p6 }
  0x42   :  { %1783 = vmatmul.mubr.msk.f32.gmra.mxu0 %vm82_vm0, %v2197_v10 }
  0x43   :  { %1873 = vmatprep.mubr.msk.f32.mxu0 %vm2135_vm1, %v2134_v0 }
  0xfe   :  { %v2205_v11 = vpop.f32.mrf.mxu0 }
  0xff   :  { %347 = vrot.lane.b32.xlu1 %v2205_v11, %s2136_s2  ;;  %167 = vrot.lane.b32.xlu0 %v2205_v11, %s2137_s3 }
 0x100   :  { %v2210_v12 = vpop.f32.mrf.mxu0 }
 0x102   :  { %v2212_v13 = vpop.f32.mrf.mxu0 }
 0x103   :  { %425 = vrot.lane.b32.xlu1 %v2212_v13, %s2136_s2  ;;  %245 = vrot.lane.b32.xlu0 %v2212_v13, %s2137_s3 }
 0x104   :  { %v2241_v22 = vpop.f32.mrf.mxu0 }
 0x107   :  { %423 = vrot.lane.b32.xlu1 %v2212_v13, %s2138_s11  ;;  %345 = vrot.lane.b32.xlu0 %v2205_v11, %s2138_s11 }
 0x171   :  { %v348_v14 = vpop.permute.xlu1 %347  ;;  %v168_v15 = vpop.permute.xlu0 %167 }
 0x172   :  { %1857 = vmatpush3.xpose.msk.msra.mxu1 %vm169_vm2, %v168_v15 }
 0x173   :  { %1861 = vmatprep.subr.mxu1 %v2134_v0 }
 0x175   :  { %1859 = vmatmul.mubr.msk.f32.vlgmr.msra.gmra.mxu1 %vm169_vm2, %v2205_v11  ;;  %v426_v16 = vpop.permute.xlu1 %425  ;;  %v246_v17 = vpop.permute.xlu0 %245 }
 0x176   :  { %1862 = vmatpush3.xpose.msk.msra.mxu1 %vm169_vm2, %v246_v17  ;;  %1872 = vmatpush3.xpose.msk.msra.mxu0 %vm169_vm2, %v426_v16 }
 0x177   :  { %1863 = vmatprep.mubr.msk.f32.mxu1 %vm2135_vm1, %v2134_v0  ;;  %1866 = vmatprep.subr.mxu1 %v2134_v0 }
 0x178   :  { %1881 = vmatprep.subr.mxu0 %v2134_v0 }
 0x179   :  { %v424_v18 = vpop.permute.xlu1 %423  ;;  %1864 = vmatmul.mubr.msk.f32.vlgmr.msra.gmra.mxu1 %vm169_vm2, %v2212_v13  ;;  %v346_v19 = vpop.permute.xlu0 %345 }
 0x17a   :  { %1867 = vmatpush3.xpose.msk.msra.mxu1 %vm169_vm2, %v348_v14  ;;  %1874 = vmatmul.mubr.msk.f32.vlgmr.msra.gmra.mxu0 %vm169_vm2, %v424_v18 }
 0x17b   :  { %1868 = vmatprep.mubr.msk.f32.mxu1 %vm2135_vm1, %v2134_v0  ;;  %1876 = vmatprep.subr.mxu1 %v2134_v0 }
 0x17c   :  { %1883 = vmatprep.mubr.msk.f32.mxu0 %vm2135_vm1, %v2134_v0 }
 0x17d   :  { %1869 = vmatmul.mubr.msk.f32.vlgmr.msra.gmra.mxu1 %vm169_vm2, %v346_v19 }
 0x17e   :  { %1878 = vmatprep.mubr.msk.f32.mxu1 %vm2135_vm1, %v2134_v0 }
 0x235   :  { %v240_v20 = vpop.f32.mrf.mxu1 }
 0x236   :  { %v321_v32 = vmul.f32 0.17677669, %v240_v20 }
 0x237   :  { %v1860_v21 = vpop.f32.mrf.mxu1 }
 0x238   :  { %v323_v35 = vsel %vm169_vm2, %v321_v32, -inf }
 0x239   :  { %v317_v23 = vpop.f32.mrf.mxu1 }
 0x23a   :  { %v497_v24 = vpop.f32.mrf.mxu0  ;;  %v322_v34 = vmul.f32 0.17677669, %v317_v23 }
 0x23b   :  { %v502_v25 = vmul.f32 0.17677669, %v497_v24  ;;  %v1865_v26 = vpop.f32.mrf.mxu1 }
 0x23c   :  { %v1875_v27 = vpop.f32.mrf.mxu0  ;;  %v326_v36 = vsel %vm169_vm2, %v322_v34, -inf }
 0x23d   :  { %v419_v28 = vpop.f32.mrf.mxu1  ;;  %v506_v29 = vsel %vm169_vm2, %v502_v25, -inf }
 0x23e   :  { %v501_v30 = vmul.f32 0.17677669, %v419_v28  ;;  %507 = vmax.xlane.f32.xlu1 %v506_v29 }
 0x23f   :  { %v1870_v31 = vpop.f32.mrf.mxu1 }
 0x240   :  { %v503_v33 = vsel %vm169_vm2, %v501_v30, -inf }
 0x241   :  { %504 = vmax.xlane.f32.xlu0 %v503_v33 }
 0x245   :  { %324 = vmax.xlane.f32.xlu0 %v323_v35 }
 0x249   :  { %327 = vmax.xlane.f32.xlu0 %v326_v36 }
 0x24f   :  { %525 = vrot.lane.b32.xlu1 %v2205_v11, %s2139_s12 }
 0x253   :  { %677 = vrot.lane.b32.xlu1 %v2205_v11, %s2140_s13 }
 0x257   :  { %753 = vrot.lane.b32.xlu1 %v2212_v13, %s2140_s13 }
 0x25f   :  { %601 = vrot.lane.b32.xlu0 %v2212_v13, %s2139_s12 }
 0x263   :  { %831 = vrot.lane.b32.xlu0 %v2205_v11, %s2141_s14 }
 0x2c7   :  { %v508_v37 = vpop.xlane.xlu1 %507 }
 0x2c8   :  { %v510_v38 = vsub.f32 %v502_v25, %v508_v37 }
 0x2ca   :  { %v513_v39 = vmul.f32 1.442695, %v510_v38  ;;  %v505_v40 = vpop.xlane.xlu0 %504 }
 0x2cb   :  { %v526_v41 = vpop.permute.xlu1 %525  ;;  %v509_v42 = vsub.f32 %v501_v30, %v505_v40 }
 0x2cc   :  { %1978 = vpow2.f32 %v513_v39  ;;  %1877 = vmatpush3.msra.mxu1 %v526_v41 }
 0x2cd   :  { %1886 = vmatprep.subr.mxu1 %v2134_v0  ;;  %v511_v45 = vmul.f32 1.442695, %v509_v42 }
 0x2ce   :  { %v325_v43 = vpop.xlane.xlu0 %324 }
 0x2cf   :  { %v329_v44 = vsub.f32 %v321_v32, %v325_v43  ;;  %v678_v60 = vpop.permute.xlu1 %677 }
 0x2d1   :  { %v331_v46 = vmul.f32 1.442695, %v329_v44 }
 0x2d2   :  { %v328_v47 = vpop.xlane.xlu0 %327 }
 0x2d3   :  { %1980 = vpow2.f32 %v331_v46  ;;  %v330_v48 = vsub.f32 %v322_v34, %v328_v47  ;;  %v754_v62 = vpop.permute.xlu1 %753 }
 0x2d4   :  { %1982 = vpow2.f32 %v511_v45 }
 0x2d5   :  { %v333_v49 = vmul.f32 1.442695, %v330_v48 }
 0x2d6   :  { %v602_v50 = vpop.permute.xlu0 %601 }
 0x2d7   :  { %1984 = vpow2.f32 %v333_v49  ;;  %1882 = vmatpush3.msra.mxu0 %v602_v50 }
 0x2d8   :  { %1891 = vmatprep.subr.mxu0 %v2134_v0 }
 0x2d9   :  { %v1979_v51 = vpop.eup %1978 }
 0x2da   :  { %v518_v52 = vsel %vm169_vm2, %v1979_v51, 0.0  ;;  %v832_v59 = vpop.permute.xlu0 %831 }
 0x2db   :  { %519 = vadd.xlane.f32.xlu0 %v518_v52 }
 0x2e0   :  { %v1981_v53 = vpop.eup %1980 }
 0x2e1   :  { %v335_v54 = vsel %vm169_vm2, %v1981_v53, 0.0  ;;  %v1983_v55 = vpop.eup %1982 }
 0x2e2   :  { %336 = vadd.xlane.f32.xlu1 %v335_v54  ;;  %v515_v57 = vsel %vm169_vm2, %v1983_v55, 0.0 }
 0x2e4   :  { %v1985_v56 = vpop.eup %1984 }
 0x2e5   :  { %v338_v58 = vsel %vm169_vm2, %v1985_v56, 0.0 }
 0x2e6   :  { %516 = vadd.xlane.f32.xlu1 %v515_v57  ;;  %339 = vadd.xlane.f32.xlu0 %v338_v58 }
 0x2f7   :  { %909 = vrot.lane.b32.xlu1 %v2212_v13, %s2141_s14 }
 0x2fb   :  { %907 = vrot.lane.b32.xlu1 %v2212_v13, %s2142_s15 }
 0x2fc   :  { %829 = vrot.lane.b32.xlu0 %v2205_v11, %s2142_s15 }
 0x364   :  { %v520_v61 = vpop.xlane.xlu0 %519 }
 0x365   :  { %1986 = vrcp.f32 %v520_v61 }
 0x36b   :  { %v337_v63 = vpop.xlane.xlu1 %336 }
 0x36f   :  { %v340_v1 = vpop.xlane.xlu0 %339  ;;  %v517_v2 = vpop.xlane.xlu1 %516 }
 0x370   :  { %1988 = vrcp.f32 %v340_v1 }
 0x371   :  { %1990 = vrcp.f32 %v517_v2 }
 0x372   :  { %v1987_v3 = vpop.eup %1986  ;;  %1992 = vrcp.f32 %v337_v63 }
 0x373   :  { %v524_v4 = vmul.f32 %v1987_v3, %v1979_v51  ;;  %v910_v6 = vpop.permute.xlu1 %909  ;;  %v830_v18 = vpop.permute.xlu0 %829 }
 0x375   :  { %1884 = vmatmul.mubr.msk.f32.vlgmr.msra.gmra.mxu0 %vm169_vm2, %v524_v4 }
 0x376   :  { %1892 = vmatpush3.msra.mxu0 %v754_v62  ;;  %1893 = vmatprep.mubr.msk.f32.mxu0 %vm2135_vm1, %v2134_v0 }
 0x377   :  { %1901 = vmatprep.subr.mxu0 %v2134_v0  ;;  %v908_v16 = vpop.permute.xlu1 %907 }
 0x37d   :  { %v1989_v5 = vpop.eup %1988 }
 0x37e   :  { %v1991_v7 = vpop.eup %1990  ;;  %v344_v8 = vmul.f32 %v1989_v5, %v1985_v56 }
 0x37f   :  { %v522_v14 = vmul.f32 %v1991_v7, %v1983_v55  ;;  %v1993_v15 = vpop.eup %1992 }
 0x380   :  { %1894 = vmatmul.mubr.msk.f32.vlgmr.msra.gmra.mxu0 %vm169_vm2, %v344_v8  ;;  %v342_v17 = vmul.f32 %v1993_v15, %v1981_v53 }
 0x381   :  { %1879 = vmatmul.mubr.msk.f32.vlgmr.msra.gmra.mxu1 %vm169_vm2, %v522_v14  ;;  %1902 = vmatpush3.xpose.msk.msra.mxu0 %vm169_vm2, %v910_v6 }
 0x382   :  { %1887 = vmatpush3.msra.mxu1 %v678_v60  ;;  %1888 = vmatprep.mubr.msk.f32.mxu1 %vm2135_vm1, %v2134_v0 }
 0x383   :  { %1896 = vmatprep.subr.mxu1 %v2134_v0  ;;  %1903 = vmatprep.mubr.msk.f32.mxu0 %vm2135_vm1, %v2134_v0 }
 0x384   :  { %1911 = vmatprep.subr.mxu0 %v2134_v0  ;;  %1904 = vmatmul.mubr.msk.f32.vlgmr.msra.gmra.mxu0 %vm169_vm2, %v908_v16 }
 0x385   :  { %1889 = vmatmul.mubr.msk.f32.vlgmr.msra.gmra.mxu1 %vm169_vm2, %v342_v17  ;;  %1912 = vmatpush3.msra.mxu0 %v2241_v22 }
 0x386   :  { %1897 = vmatpush3.xpose.msk.msra.mxu1 %vm169_vm2, %v832_v59  ;;  %1898 = vmatprep.mubr.msk.f32.mxu1 %vm2135_vm1, %v2134_v0 }
 0x387   :  { %1906 = vmatprep.subr.mxu1 %v2134_v0  ;;  %1913 = vmatprep.mubr.msk.f32.mxu0 %vm2135_vm1, %v2134_v0 }
 0x388   :  { %1921 = vmatprep.subr.mxu0 %v2134_v0 }
 0x389   :  { %1899 = vmatmul.mubr.msk.f32.vlgmr.msra.gmra.mxu1 %vm169_vm2, %v830_v18 }
 0x38a   :  { %1907 = vmatpush3.msra.mxu1 %v2210_v12  ;;  %1908 = vmatprep.mubr.msk.f32.mxu1 %vm2135_vm1, %v2134_v0 }
 0x38b   :  { %1916 = vmatprep.subr.mxu1 %v2134_v0 }
 0x435   :  { %v673_v19 = vpop.f32.mrf.mxu0 }
 0x437   :  { %v1885_v20 = vpop.f32.mrf.mxu0 }
 0x440   :  { %v825_v21 = vpop.f32.mrf.mxu0 }
 0x441   :  { %v597_v23 = vpop.f32.mrf.mxu1  ;;  %v826_v24 = vadd.f32 %v825_v21, %v673_v19 }
 0x442   :  { %v1895_v25 = vpop.f32.mrf.mxu0 }
 0x443   :  { %v1880_v26 = vpop.f32.mrf.mxu1 }
 0x444   :  { %v981_v27 = vpop.f32.mrf.mxu0 }
 0x445   :  { %v749_v28 = vpop.f32.mrf.mxu1  ;;  %v986_v29 = vmul.f32 0.17677669, %v981_v27 }
 0x446   :  { %v750_v30 = vadd.f32 %v749_v28, %v597_v23  ;;  %v1905_v31 = vpop.f32.mrf.mxu0 }
 0x447   :  { %v1890_v32 = vpop.f32.mrf.mxu1  ;;  %v990_v33 = vsel %vm169_vm2, %v986_v29, -inf }
 0x448   :  { %991 = vmax.xlane.f32.xlu1 %v990_v33 }
 0x449   :  { %v903_v34 = vpop.f32.mrf.mxu1 }
 0x44a   :  { %v985_v35 = vmul.f32 0.17677669, %v903_v34 }
 0x44b   :  { %v1900_v36 = vpop.f32.mrf.mxu1 }
 0x44c   :  { %v987_v37 = vsel %vm169_vm2, %v985_v35, -inf }
 0x44d   :  { %988 = vmax.xlane.f32.xlu0 %v987_v37 }
 0x459   :  { %1159 = vrot.lane.b32.xlu1 %v2205_v11, %s2143_s16 }
 0x45d   :  { %1157 = vrot.lane.b32.xlu1 %v2205_v11, %s2144_s17 }
 0x461   :  { %1235 = vrot.lane.b32.xlu1 %v2212_v13, %s2144_s17 }
 0x4d1   :  { %v992_v38 = vpop.xlane.xlu1 %991 }
 0x4d2   :  { %v994_v39 = vsub.f32 %v986_v29, %v992_v38  ;;  %v1493_v29 = vlaneseq }
 0x4d4   :  { %v997_v40 = vmul.f32 1.442695, %v994_v39 }
 0x4d5   :  { %v1160_v49 = vpop.permute.xlu1 %1159 }
 0x4d6   :  { %1994 = vpow2.f32 %v997_v40  ;;  %v989_v41 = vpop.xlane.xlu0 %988 }
 0x4d7   :  { %v993_v42 = vsub.f32 %v985_v35, %v989_v41 }
 0x4d9   :  { %v995_v43 = vmul.f32 1.442695, %v993_v42  ;;  %v1158_v51 = vpop.permute.xlu1 %1157 }
 0x4db   :  { %1996 = vpow2.f32 %v995_v43 }
 0x4e3   :  { %v1995_v44 = vpop.eup %1994 }
 0x4e4   :  { %v1002_v45 = vsel %vm169_vm2, %v1995_v44, 0.0 }
 0x4e5   :  { %1003 = vadd.xlane.f32.xlu0 %v1002_v45 }
 0x4e8   :  { %v1997_v46 = vpop.eup %1996 }
 0x4e9   :  { %v999_v47 = vsel %vm169_vm2, %v1997_v46, 0.0 }
 0x4ea   :  { %1000 = vadd.xlane.f32.xlu0 %v999_v47 }
 0x500   :  { %1237 = vrot.lane.b32.xlu0 %v2212_v13, %s2143_s16  ;;  %v1236_v13 = vpop.permute.xlu1 %1235 }
 0x56e   :  { %v1004_v11 = vpop.xlane.xlu0 %1003 }
 0x56f   :  { %1998 = vrcp.f32 %v1004_v11 }
 0x573   :  { %v1001_v48 = vpop.xlane.xlu0 %1000 }
 0x574   :  { %2000 = vrcp.f32 %v1001_v48 }
 0x577   :  { %v1238_v53 = vpop.permute.xlu0 %1237 }
 0x57c   :  { %v1999_v50 = vpop.eup %1998 }
 0x57d   :  { %v1008_v52 = vmul.f32 %v1999_v50, %v1995_v44 }
 0x57f   :  { %1914 = vmatmul.mubr.msk.f32.vlgmr.msra.gmra.mxu0 %vm169_vm2, %v1008_v52  ;;  %v1543_v52 = vld [vmem:[#allocation7 + $0x18] sm:$0xff] }
 0x580   :  { %1922 = vmatpush3.xpose.msk.msra.mxu0 %vm169_vm2, %v1238_v53  ;;  %1923 = vmatprep.mubr.msk.f32.mxu0 %vm2135_vm1, %v2134_v0  ;;  %v1542_v53 = vld [vmem:[#allocation7 + $0x10] sm:$0xff] }
 0x581   :  { %v2001_v54 = vpop.eup %2000  ;;  %1931 = vmatprep.subr.mxu0 %v2134_v0 }
 0x582   :  { %v1006_v55 = vmul.f32 %v2001_v54, %v1997_v46  ;;  %v1541_v54 = vld [vmem:[#allocation7 + $0x8] sm:$0xff] }
 0x583   :  { %1924 = vmatmul.mubr.msk.f32.vlgmr.msra.gmra.mxu0 %vm169_vm2, %v1236_v13  ;;  %v1540_v13 = vld [vmem:[#allocation7] sm:$0xff] }
 0x584   :  { %1909 = vmatmul.mubr.msk.f32.vlgmr.msra.gmra.mxu1 %vm169_vm2, %v1006_v55  ;;  %1933 = vmatprep.mubr.msk.f32.mxu0 %vm2135_vm1, %v2134_v0 }
 0x585   :  { %1917 = vmatpush3.xpose.msk.msra.mxu1 %vm169_vm2, %v1160_v49  ;;  %1918 = vmatprep.mubr.msk.f32.mxu1 %vm2135_vm1, %v2134_v0 }
 0x586   :  { %1926 = vmatprep.subr.mxu1 %v2134_v0 }
 0x588   :  { %1919 = vmatmul.mubr.msk.f32.vlgmr.msra.gmra.mxu1 %vm169_vm2, %v1158_v51 }
 0x589   :  { %1928 = vmatprep.mubr.msk.f32.mxu1 %vm2135_vm1, %v2134_v0 }
 0x63f   :  { %v1151_v56 = vpop.f32.mrf.mxu0 }
 0x640   :  { %v1156_v57 = vadd.f32 %v1151_v56, %v826_v24 }
 0x641   :  { %v1915_v58 = vpop.f32.mrf.mxu0 }
 0x643   :  { %v1309_v59 = vpop.f32.mrf.mxu0 }
 0x644   :  { %v1078_v60 = vpop.f32.mrf.mxu1  ;;  %v1314_v61 = vmul.f32 0.17677669, %v1309_v59 }
 0x645   :  { %v1155_v62 = vadd.f32 %v1078_v60, %v750_v30  ;;  %v1925_v63 = vpop.f32.mrf.mxu0  ;;  %v2325_v30 = vshrl.u32 %v1493_v29, 7 }
 0x646   :  { %v1910_v1 = vpop.f32.mrf.mxu1  ;;  %v1318_v2 = vsel %vm169_vm2, %v1314_v61, -inf }
 0x647   :  { %1319 = vmax.xlane.f32.xlu1 %v1318_v2  ;;  %v1495_v31 = vsub.s32 0, %v2325_v30  ;;  %v1534_v2 = vsub.s32 2, %v2325_v30 }
 0x648   :  { %v1231_v3 = vpop.f32.mrf.mxu1 }
 0x649   :  { %v1313_v4 = vmul.f32 0.17677669, %v1231_v3 }
 0x64a   :  { %v1920_v5 = vpop.f32.mrf.mxu1 }
 0x64b   :  { %v1315_v6 = vsel %vm169_vm2, %v1313_v4, -inf }
 0x64c   :  { %1316 = vmax.xlane.f32.xlu0 %v1315_v6 }
 0x658   :  { %1338 = vrot.lane.b32.xlu1 %v2210_v12, %s2137_s3 }
 0x6d0   :  { %v1320_v0 = vpop.xlane.xlu1 %1319 }
 0x6d1   :  { %v1322_v7 = vsub.f32 %v1314_v61, %v1320_v0  ;;  %v1528_v61 = vsub.s32 1, %v2325_v30 }
 0x6d3   :  { %v1325_v8 = vmul.f32 1.442695, %v1322_v7 }
 0x6d4   :  { %v1339_v14 = vpop.permute.xlu1 %1338 }
 0x6d5   :  { %2002 = vpow2.f32 %v1325_v8  ;;  %v1317_v15 = vpop.xlane.xlu0 %1316  ;;  %1927 = vmatpush3.msra.mxu1 %v1339_v14 }
 0x6d6   :  { %v1321_v16 = vsub.f32 %v1313_v4, %v1317_v15  ;;  %1936 = vmatprep.subr.mxu1 %v1543_v52 }
 0x6d8   :  { %v1323_v17 = vmul.f32 1.442695, %v1321_v16  ;;  %v1635_v16 = vld [vmem:[#allocation7 + $0x38] sm:$0xff] }
 0x6da   :  { %2004 = vpow2.f32 %v1323_v17  ;;  %v1634_v17 = vld [vmem:[#allocation7 + $0x30] sm:$0xff] }
 0x6e2   :  { %v2003_v18 = vpop.eup %2002 }
 0x6e3   :  { %v1330_v19 = vsel %vm169_vm2, %v2003_v18, 0.0 }
 0x6e4   :  { %1331 = vadd.xlane.f32.xlu0 %v1330_v19  ;;  %v1632_v19 = vld [vmem:[#allocation7 + $0x20] sm:$0xff] }
 0x6e7   :  { %v2005_v20 = vpop.eup %2004 }
 0x6e8   :  { %v1327_v21 = vsel %vm169_vm2, %v2005_v20, 0.0 }
 0x6e9   :  { %1328 = vadd.xlane.f32.xlu0 %v1327_v21 }
 0x6ff   :  { %1415 = vrot.lane.b32.xlu0 %v2241_v22, %s2137_s3  ;;  %v2328_v22 = vld [vmem:[#allocation8] sm:$0xff] }
 0x700   :  { %v1496_v32 = vrot.slane %v2328_v22, %v1495_v31  ;;  %v1529_v1 = vrot.slane %v2328_v22, %v1528_v61  ;;  %v1535_v5 = vrot.slane %v2328_v22, %v1534_v2 }
 0x76d   :  { %v1332_v12 = vpop.xlane.xlu0 %1331 }
 0x76e   :  { %2006 = vrcp.f32 %v1332_v12 }
 0x772   :  { %v1329_v23 = vpop.xlane.xlu0 %1328 }
 0x773   :  { %2008 = vrcp.f32 %v1329_v23 }
 0x776   :  { %v1416_v24 = vpop.permute.xlu0 %1415 }
 0x777   :  { %1932 = vmatpush3.msra.mxu0 %v1416_v24 }
 0x778   :  { %1947 = vmatprep.subr.mxu0 %v1635_v16 }
 0x77b   :  { %v2007_v25 = vpop.eup %2006 }
 0x77c   :  { %v1336_v26 = vmul.f32 %v2007_v25, %v2003_v18  ;;  %v1633_v18 = vld [vmem:[#allocation7 + $0x28] sm:$0xff] }
 0x77e   :  { %1934 = vmatmul.mubr.msk.f32.vlgmr.msra.gmra.mxu0 %vm169_vm2, %v1336_v26  ;;  %v1638_v26 = vsub.s32 4, %v2325_v30 }
 0x77f   :  { %1948 = vmatpush3.msra.mxu0 %v1635_v16 }
 0x780   :  { %v2009_v27 = vpop.eup %2008  ;;  %1949 = vmatprep.subr.mxu0 %v1634_v17 }
 0x781   :  { %v1334_v28 = vmul.f32 %v2009_v27, %v2005_v20  ;;  %1950 = vmatpush3.msra.mxu0 %v1634_v17  ;;  %v1639_v27 = vrot.slane %v2328_v22, %v1638_v26 }
 0x782   :  { %1951 = vmatprep.subr.mxu0 %v1633_v18 }
 0x783   :  { %1929 = vmatmul.mubr.msk.f32.vlgmr.msra.gmra.mxu1 %vm169_vm2, %v1334_v28  ;;  %1952 = vmatpush3.msra.mxu0 %v1633_v18 }
 0x784   :  { %1937 = vmatpush3.msra.mxu1 %v1543_v52  ;;  %1953 = vmatprep.subr.mxu0 %v1632_v19 }
 0x785   :  { %1938 = vmatprep.subr.mxu1 %v1542_v53  ;;  %1954 = vmatpush3.msra.mxu0 %v1632_v19 }
 0x786   :  { %1939 = vmatpush3.msra.mxu1 %v1542_v53 }
 0x787   :  { %1940 = vmatprep.subr.mxu1 %v1541_v54 }
 0x788   :  { %1941 = vmatpush3.msra.mxu1 %v1541_v54 }
 0x789   :  { %1942 = vmatprep.subr.mxu1 %v1540_v13 }
 0x78a   :  { %1943 = vmatpush3.msra.mxu1 %v1540_v13 }
 0x83e   :  { %v1487_v33 = vpop.f32.mrf.mxu0 }
 0x83f   :  { %v1492_v34 = vadd.f32 %v1487_v33, %v1156_v57 }
 0x840   :  { %v1935_v35 = vpop.f32.mrf.mxu0 }
 0x841   :  { %v1498_v36 = vadd.f32 %v1496_v32, %v1492_v34 }
 0x843   :  { %v1410_v37 = vpop.f32.mrf.mxu1  ;;  %v1502_v38 = vsel %vm82_vm0, %v1498_v36, 0.0 }
 0x844   :  { %v1491_v39 = vadd.f32 %v1410_v37, %v1155_v62  ;;  %1503 = vadd.xlane.f32.xlu0 %v1502_v38 }
 0x845   :  { %v1930_v40 = vpop.f32.mrf.mxu1 }
 0x846   :  { %v1497_v41 = vadd.f32 %v1496_v32, %v1491_v39 }
 0x848   :  { %v1499_v42 = vsel %vm82_vm0, %v1497_v41, 0.0 }
 0x849   :  { %1500 = vadd.xlane.f32.xlu1 %v1499_v42 }
 0x8cd   :  { %v1504_v43 = vpop.xlane.xlu0 %1503 }
 0x8ce   :  { %v1507_v44 = vmul.f32 0.03125, %v1504_v43 }
 0x8d0   :  { %v1509_v45 = vsub.f32 %v1498_v36, %v1507_v44 }
 0x8d2   :  { %v1501_v46 = vpop.xlane.xlu1 %1500  ;;  %v1511_v47 = vmul.f32 %v1509_v45, %v1509_v45 }
 0x8d3   :  { %v1506_v11 = vmul.f32 0.03125, %v1501_v46 }
 0x8d4   :  { %v1515_v48 = vsel %vm82_vm0, %v1511_v47, 0.0 }
 0x8d5   :  { %v1508_v49 = vsub.f32 %v1497_v41, %v1506_v11  ;;  %1516 = vadd.xlane.f32.xlu0 %v1515_v48 }
 0x8d7   :  { %v1510_v50 = vmul.f32 %v1508_v49, %v1508_v49 }
 0x8d9   :  { %v1512_v51 = vsel %vm82_vm0, %v1510_v50, 0.0  ;;  %v1749_v50 = vsub.s32 5, %v2325_v30 }
 0x8da   :  { %1513 = vadd.xlane.f32.xlu1 %v1512_v51  ;;  %v1755_v51 = vsub.s32 6, %v2325_v30 }
 0x8db   :  { %v1750_v52 = vrot.slane %v2328_v22, %v1749_v50 }
 0x8dc   :  { %v1756_v13 = vrot.slane %v2328_v22, %v1755_v51 }
 0x95e   :  { %v1517_v55 = vpop.xlane.xlu0 %1516 }
 0x95f   :  { %v1519_v56 = vmul.f32 0.03125, %v1517_v55 }
 0x961   :  { %v1521_v57 = vadd.f32 1e-05, %v1519_v56 }
 0x963   :  { %2010 = vrsqrt.f32 %v1521_v57  ;;  %v1514_v58 = vpop.xlane.xlu1 %1513 }
 0x964   :  { %v1518_v59 = vmul.f32 0.03125, %v1514_v58 }
 0x966   :  { %v1520_v60 = vadd.f32 1e-05, %v1518_v59 }
 0x968   :  { %2012 = vrsqrt.f32 %v1520_v60 }
 0x970   :  { %v2011_v62 = vpop.eup %2010 }
 0x971   :  { %v1525_v63 = vmul.f32 %v2011_v62, %v1509_v45 }
 0x973   :  { %v1531_v4 = vmul.f32 %v1529_v1, %v1525_v63 }
 0x975   :  { %v2013_v3 = vpop.eup %2012  ;;  %v1537_v7 = vadd.f32 %v1535_v5, %v1531_v4 }
 0x976   :  { %v1524_v6 = vmul.f32 %v2013_v3, %v1508_v49 }
 0x977   :  { %v2343_v15 = vadd.f32 %v1537_v7, %v2197_v10 }
 0x978   :  { %v1530_v0 = vmul.f32 %v1529_v1, %v1524_v6 }
 0x97a   :  { %v1536_v8 = vadd.f32 %v1535_v5, %v1530_v0 }
 0x97c   :  { %v2340_v14 = vadd.f32 %v1536_v8, %v2191_v9  ;;  %v1546_v9 = vsub.s32 3, %v2325_v30 }
 0x97e   :  { %1944 = vmatprep.mubr.msk.f32.mxu1 %vm82_vm0, %v2340_v14  ;;  %v1547_v10 = vrot.slane %v2328_v22, %v1546_v9 }
 0x97f   :  { %1945 = vmatmul.mubr.msk.f32.vlgmr.msra.gmra.mxu1 %vm82_vm0, %v2343_v15 }
 0xa3f   :  { %v1946_v20 = vpop.f32.mrf.mxu1 }
 0xa40   :  { %v1626_v21 = vadd.f32 %v1946_v20, %v1547_v10 }
 0xa41   :  { %v1620_v12 = vpop.f32.mrf.mxu1 }
 0xa42   :  { %v1621_v23 = vadd.f32 %v1620_v12, %v1547_v10  ;;  %v1630_v25 = vmax.f32 %v1626_v21, 0.0 }
 0xa44   :  { %v1629_v24 = vmax.f32 %v1621_v23, 0.0 }
 0xa46   :  { %1955 = vmatprep.mubr.msk.f32.mxu0 %vm82_vm0, %v1629_v24 }
 0xa47   :  { %1956 = vmatmul.mubr.msk.f32.vlgmr.msra.gmra.mxu0 %vm82_vm0, %v1630_v25 }
 0xb07   :  { %v1957_v28 = vpop.f32.mrf.mxu0 }
 0xb08   :  { %v1718_v29 = vadd.f32 %v1957_v28, %v1639_v27 }
 0xb09   :  { %v1712_v31 = vpop.f32.mrf.mxu0 }
 0xb0a   :  { %v1713_v32 = vadd.f32 %v1712_v31, %v1639_v27  ;;  %v1724_v33 = vsel %vm82_vm0, %v1718_v29, 0.0 }
 0xb0b   :  { %1725 = vadd.xlane.f32.xlu0 %v1724_v33 }
 0xb0c   :  { %v1721_v34 = vsel %vm82_vm0, %v1713_v32, 0.0 }
 0xb0d   :  { %1722 = vadd.xlane.f32.xlu1 %v1721_v34 }
 0xb94   :  { %v1726_v35 = vpop.xlane.xlu0 %1725 }
 0xb95   :  { %v1728_v36 = vmul.f32 0.03125, %v1726_v35 }
 0xb96   :  { %v1723_v37 = vpop.xlane.xlu1 %1722 }
 0xb97   :  { %v1730_v38 = vsub.f32 %v1718_v29, %v1728_v36  ;;  %v1727_v39 = vmul.f32 0.03125, %v1723_v37 }
 0xb99   :  { %v1729_v40 = vsub.f32 %v1713_v32, %v1727_v39  ;;  %v1732_v41 = vmul.f32 %v1730_v38, %v1730_v38 }
 0xb9b   :  { %v1736_v42 = vsel %vm82_vm0, %v1732_v41, 0.0  ;;  %v1731_v43 = vmul.f32 %v1729_v40, %v1729_v40 }
 0xb9c   :  { %1737 = vadd.xlane.f32.xlu0 %v1736_v42 }
 0xb9d   :  { %v1733_v44 = vsel %vm82_vm0, %v1731_v43, 0.0 }
 0xb9e   :  { %1734 = vadd.xlane.f32.xlu1 %v1733_v44 }
 0xc25   :  { %v1738_v45 = vpop.xlane.xlu0 %1737 }
 0xc26   :  { %v1740_v46 = vmul.f32 0.03125, %v1738_v45 }
 0xc27   :  { %v1735_v47 = vpop.xlane.xlu1 %1734 }
 0xc28   :  { %v1742_v11 = vadd.f32 1e-05, %v1740_v46  ;;  %v1739_v48 = vmul.f32 0.03125, %v1735_v47 }
 0xc2a   :  { %2014 = vrsqrt.f32 %v1742_v11  ;;  %v1741_v49 = vadd.f32 1e-05, %v1739_v48 }
 0xc2c   :  { %2016 = vrsqrt.f32 %v1741_v49 }
 0xc37   :  { %v2015_v53 = vpop.eup %2014 }
 0xc38   :  { %v1746_v54 = vmul.f32 %v2015_v53, %v1730_v38 }
 0xc39   :  { %v2017_v55 = vpop.eup %2016 }
 0xc3a   :  { %v1745_v56 = vmul.f32 %v2017_v55, %v1729_v40  ;;  %v1752_v57 = vmul.f32 %v1750_v52, %v1746_v54 }
 0xc3c   :  { %v1751_v58 = vmul.f32 %v1750_v52, %v1745_v56  ;;  %v1758_v59 = vadd.f32 %v1756_v13, %v1752_v57 }
 0xc3e   :  { %v1757_v60 = vadd.f32 %v1756_v13, %v1751_v58  ;;  %v1760_v61 = vadd.f32 %v1758_v59, %v2343_v15 }
 0xc40   :  { %v1759_v62 = vadd.f32 %v1757_v60, %v2340_v14  ;;  %1762 = vst.msk [vmem:[#allocation10 + $0x8] sm:$0xff] %vm82_vm0, %v1760_v61 }
 0xc42   :  { %1761 = vst.msk [vmem:[#allocation10] sm:$0xff] %vm82_vm0, %v1759_v62 }
 0xc43   :  { %2109 = shalt.err (!%p2106_p10)
}
 0xc44   :  { %1774 = dma.vmem_to_hbm [thread:$0]  %s1769_s19, 256, %s2377_s4, [#allocation4], %s2130_s25, %s2130_s25, %s2131_s26  }
 0xc45   :  { %2124 = dma.done.wait [#allocation4], 256  }
 0xc46   :  { %2125 = vsyncadd [#allocation4], 4294967040 }
 0xc47   :  { %1778 = vsyncpa [#allocation3], 1 }
 0xc48   :  { %1779 = vsyncpa [#allocation6], 1 }
 0xc49   :  { %1780 = vsyncpa [#allocation9], 1 }
 0xc4a   :  { %1781 = vsyncpa [#allocation4], 1 }

</bundles_post_ra>
